<compile_context>
chip_gen: v7x
topology: tpu7x:2x2x1
jax: 0.10.0
libtpu: 0.0.40
codegen_flags: <defaults>
</compile_context>

<pallas_src>
import jax
import jax.numpy as jnp
from jax.experimental import pallas as pl
from jax.experimental.pallas import tpu as pltpu


def _relu6(x):
    return jnp.clip(x, 0.0, 6.0)


def _pick_tile(hw, cap=2048):
    """Largest pixel tile <= cap that evenly divides hw (lane-aligned when tiled)."""
    if hw <= cap:
        return hw                       # full row: always a legal block dim
    for t in range(cap - cap % 128, 127, -128):
        if hw % t == 0:
            return t
    return hw                           # fallback: whole row per step


def lfcd_loss_branch(x_nchw, params, *, tile_px=None, matmul_dtype=jnp.float32):
    """x_nchw: (N, Cin, H, W) float32. Returns (score, locations) in NCHW.

    params: PyTorch-layout 1x1-conv weights/biases
      (w1(Co,Ci), b1(Co), ws1, bs1, ws2, bs2, wl1, bl1, wl2, bl2)
    """
    (w1, b1, ws1, bs1, ws2, bs2, wl1, bl1, wl2, bl2) = params
    N, Cin, H, W = x_nchw.shape
    HW = H * W
    Cmid = w1.shape[0]
    ncls = ws2.shape[0]
    nloc = wl2.shape[0]
    nout = ncls + nloc

    if tile_px is None:
        tile_px = _pick_tile(HW)
    assert HW % tile_px == 0, "pixel tile must divide H*W"

    # ---- parameter packing (traced once) ----------------------------------
    # Fused head-1 weight (ws1|wl1 stacked on the output axis) and fused
    # block-diagonal head-2 weight [[ws2, 0], [0, wl2]].
    wh1 = jnp.concatenate([ws1, wl1], axis=0)                 # (2*Cmid, Cmid)
    wh2 = jnp.zeros((nout, 2 * Cmid), w1.dtype)
    wh2 = wh2.at[:ncls, :Cmid].set(ws2)
    wh2 = wh2.at[ncls:, Cmid:].set(wl2)                       # (nout, 2*Cmid)
    # Single bias slab, column-vector layout (broadcast along the lane axis).
    bias = jnp.concatenate([b1, bs1, bl1, bs2, bl2], axis=0)[:, None]
    o_b1, o_bh1, o_bh2 = 0, Cmid, 3 * Cmid
    bias_len = 3 * Cmid + nout

    x3 = x_nchw.reshape(N, Cin, HW)     # free reshape, no transpose

    def kernel(x_ref, w1_ref, wh1_ref, wh2_ref, b_ref, out_ref):
        x = x_ref[...].astype(matmul_dtype)                          # (Cin, T)

        # Shared stem: PyTorch calls it twice with identical (stateless)
        # weights -> identical result, so compute once.
        feat = _relu6(
            jnp.dot(w1_ref[...].astype(matmul_dtype), x,
                    preferred_element_type=jnp.float32)
            + b_ref[o_b1:o_b1 + Cmid])                               # (Cmid, T)

        # Fused score/locations hidden conv + ReLU6 -> lane-dense (128, T).
        h = _relu6(
            jnp.dot(wh1_ref[...].astype(matmul_dtype),
                    feat.astype(matmul_dtype),
                    preferred_element_type=jnp.float32)
            + b_ref[o_bh1:o_bh1 + 2 * Cmid])                         # (2*Cmid, T)

        # Fused (block-diagonal) final conv -> concatenated score|loc.
        out = (jnp.dot(wh2_ref[...].astype(matmul_dtype),
                       h.astype(matmul_dtype),
                       preferred_element_type=jnp.float32)
               + b_ref[o_bh2:o_bh2 + nout])                          # (nout, T)

        out_ref[...] = out.astype(out_ref.dtype)

    grid = (N, HW // tile_px)

    out3 = pl.pallas_call(
        kernel,
        out_shape=jax.ShapeDtypeStruct((N, nout, HW), jnp.float32),
        grid=grid,
        in_specs=[
            pl.BlockSpec((None, Cin, tile_px), lambda n, i: (n, 0, i)),  # x tile
            pl.BlockSpec((Cmid, Cin), lambda n, i: (0, 0)),              # stem W
            pl.BlockSpec((2 * Cmid, Cmid), lambda n, i: (0, 0)),         # fused head-1 W
            pl.BlockSpec((nout, 2 * Cmid), lambda n, i: (0, 0)),         # fused head-2 W
            pl.BlockSpec((bias_len, 1), lambda n, i: (0, 0)),            # bias slab
        ],
        out_specs=pl.BlockSpec((None, nout, tile_px), lambda n, i: (n, 0, i)),
        compiler_params=pltpu.CompilerParams(
            dimension_semantics=("parallel", "parallel")),
    )(x3, w1, wh1, wh2, bias)

    score = out3[:, :ncls, :].reshape(N, ncls, H, W)
    loc = out3[:, ncls:, :].reshape(N, nloc, H, W)
    return score, loc


def init_params(key, in_channels, out_channels=64, num_classes=2):
    """Deterministic synthetic weights in PyTorch (Cout, Cin) conv layout."""
    ks = jax.random.split(key, 10)

    def w(k, cout, cin):
        return jax.random.normal(k, (cout, cin), jnp.float32) * 0.1

    def b(k, cout):
        return jax.random.normal(k, (cout,), jnp.float32) * 0.01

    w1 = w(ks[0], out_channels, in_channels); b1 = b(ks[1], out_channels)
    ws1 = w(ks[2], out_channels, out_channels); bs1 = b(ks[3], out_channels)
    ws2 = w(ks[4], num_classes, out_channels); bs2 = b(ks[5], num_classes)
    wl1 = w(ks[6], out_channels, out_channels); bl1 = b(ks[7], out_channels)
    wl2 = w(ks[8], 2, out_channels); bl2 = b(ks[9], 2)
    return (w1, b1, ws1, bs1, ws2, bs2, wl1, bl1, wl2, bl2)


def reference_forward(x_nchw, params):
    """Plain-JAX reference matching the PyTorch forward (channel-major)."""
    (w1, b1, ws1, bs1, ws2, bs2, wl1, bl1, wl2, bl2) = params
    N, Cin, H, W = x_nchw.shape
    x = x_nchw.reshape(N, Cin, H * W)
    feat = jnp.clip(jnp.einsum('oc,ncp->nop', w1, x) + b1[None, :, None], 0.0, 6.0)
    hs = jnp.clip(jnp.einsum('oc,ncp->nop', ws1, feat) + bs1[None, :, None], 0.0, 6.0)
    score = jnp.einsum('oc,ncp->nop', ws2, hs) + bs2[None, :, None]
    hl = jnp.clip(jnp.einsum('oc,ncp->nop', wl1, feat) + bl1[None, :, None], 0.0, 6.0)
    loc = jnp.einsum('oc,ncp->nop', wl2, hl) + bl2[None, :, None]
    return score.reshape(N, -1, H, W), loc.reshape(N, -1, H, W)


if __name__ == "__main__":
    key = jax.random.PRNGKey(0)
    k_x, k_p = jax.random.split(key)

    N, Cin, H, W = 2, 4, 16, 16
    out_channels, num_classes = 64, 2

    x = jax.random.normal(k_x, (N, Cin, H, W), jnp.float32)
    params = init_params(k_p, Cin, out_channels, num_classes)

    score, loc = lfcd_loss_branch(x, params)
    score, loc = jax.block_until_ready((score, loc))

    score_ref, loc_ref = reference_forward(x, params)
    assert score.shape == (N, num_classes, H, W)
    assert loc.shape == (N, 2, H, W)
    assert jnp.allclose(score, score_ref, atol=1e-4, rtol=1e-5)
    assert jnp.allclose(loc, loc_ref, atol=1e-4, rtol=1e-5)

    print("KERNEL_OK")
</pallas_src>

<mosaic_0001>
module attributes {stable_mosaic.version = 11 : i64} {
  func.func @kernel(%arg0: i32, %arg1: i32, %arg2: memref<1x4x256xf32, #tpu.memory_space<vmem>>, %arg3: memref<64x4xf32, #tpu.memory_space<vmem>>, %arg4: memref<128x64xf32, #tpu.memory_space<vmem>>, %arg5: memref<4x128xf32, #tpu.memory_space<vmem>>, %arg6: memref<196x1xf32, #tpu.memory_space<vmem>>, %arg7: memref<1x4x256xf32, #tpu.memory_space<vmem>>) attributes {dimension_semantics = [#tpu.dimension_semantics<parallel>, #tpu.dimension_semantics<parallel>], iteration_bounds = array<i64: 2, 1>, scalar_prefetch = 0 : i64, scratch_operands = 0 : i64, tpu.core_type = #tpu.core_type<tc>, window_params = [{transform_indices = @transform_0, window_bounds = array<i64: 1, 4, 256>}, {pipeline_mode = #tpu.pipeline_mode<synchronous>, transform_indices = @transform_1, window_bounds = array<i64: 64, 4>}, {pipeline_mode = #tpu.pipeline_mode<synchronous>, transform_indices = @transform_2, window_bounds = array<i64: 128, 64>}, {pipeline_mode = #tpu.pipeline_mode<synchronous>, transform_indices = @transform_3, window_bounds = array<i64: 4, 128>}, {pipeline_mode = #tpu.pipeline_mode<synchronous>, transform_indices = @transform_4, window_bounds = array<i64: 196, 1>}, {transform_indices = @transform_5, window_bounds = array<i64: 1, 4, 256>}]} {
    %c0 = arith.constant 0 : index
    %c0_0 = arith.constant 0 : index
    %c0_1 = arith.constant 0 : index
    %0 = vector.load %arg2[%c0, %c0_0, %c0_1] : memref<1x4x256xf32, #tpu.memory_space<vmem>>, vector<1x4x256xf32>
    %1 = vector.shape_cast %0 : vector<1x4x256xf32> to vector<4x256xf32>
    %c0_2 = arith.constant 0 : index
    %c0_3 = arith.constant 0 : index
    %2 = vector.load %arg3[%c0_2, %c0_3] : memref<64x4xf32, #tpu.memory_space<vmem>>, vector<64x4xf32>
    %cst = arith.constant dense<0.000000e+00> : vector<64x256xf32>
    %3 = tpu.matmul %2, %1, %cst {dimension_numbers = #tpu.dot_dimension_numbers<[1], [0], [0], [1], [0, 0, 1, 1], [], []>} : vector<64x4xf32>, vector<4x256xf32>, vector<64x256xf32> -> vector<64x256xf32>
    %c0_4 = arith.constant 0 : index
    %c0_5 = arith.constant 0 : index
    %4 = vector.load %arg6[%c0_4, %c0_5] : memref<196x1xf32, #tpu.memory_space<vmem>>, vector<64x1xf32>
    %5 = vector.broadcast %4 : vector<64x1xf32> to vector<64x256xf32>
    %6 = arith.addf %3, %5 : vector<64x256xf32>
    %cst_6 = arith.constant 0.000000e+00 : f32
    %cst_7 = arith.constant 6.000000e+00 : f32
    %7 = vector.broadcast %cst_6 : f32 to vector<64x256xf32>
    %8 = arith.maximumf %7, %6 : vector<64x256xf32>
    %9 = vector.broadcast %cst_7 : f32 to vector<64x256xf32>
    %10 = arith.minimumf %9, %8 : vector<64x256xf32>
    %c0_8 = arith.constant 0 : index
    %c0_9 = arith.constant 0 : index
    %11 = vector.load %arg4[%c0_8, %c0_9] : memref<128x64xf32, #tpu.memory_space<vmem>>, vector<128x64xf32>
    %cst_10 = arith.constant dense<0.000000e+00> : vector<128x256xf32>
    %12 = tpu.matmul %11, %10, %cst_10 {dimension_numbers = #tpu.dot_dimension_numbers<[1], [0], [0], [1], [0, 0, 1, 1], [], []>} : vector<128x64xf32>, vector<64x256xf32>, vector<128x256xf32> -> vector<128x256xf32>
    %c64 = arith.constant 64 : index
    %c0_11 = arith.constant 0 : index
    %13 = vector.load %arg6[%c64, %c0_11] : memref<196x1xf32, #tpu.memory_space<vmem>>, vector<128x1xf32>
    %14 = vector.broadcast %13 : vector<128x1xf32> to vector<128x256xf32>
    %15 = arith.addf %12, %14 : vector<128x256xf32>
    %cst_12 = arith.constant 0.000000e+00 : f32
    %cst_13 = arith.constant 6.000000e+00 : f32
    %16 = vector.broadcast %cst_12 : f32 to vector<128x256xf32>
    %17 = arith.maximumf %16, %15 : vector<128x256xf32>
    %18 = vector.broadcast %cst_13 : f32 to vector<128x256xf32>
    %19 = arith.minimumf %18, %17 : vector<128x256xf32>
    %c0_14 = arith.constant 0 : index
    %c0_15 = arith.constant 0 : index
    %20 = vector.load %arg5[%c0_14, %c0_15] : memref<4x128xf32, #tpu.memory_space<vmem>>, vector<4x128xf32>
    %cst_16 = arith.constant dense<0.000000e+00> : vector<4x256xf32>
    %21 = tpu.matmul %20, %19, %cst_16 {dimension_numbers = #tpu.dot_dimension_numbers<[1], [0], [0], [1], [0, 0, 1, 1], [], []>} : vector<4x128xf32>, vector<128x256xf32>, vector<4x256xf32> -> vector<4x256xf32>
    %c192 = arith.constant 192 : index
    %c0_17 = arith.constant 0 : index
    %22 = vector.load %arg6[%c192, %c0_17] : memref<196x1xf32, #tpu.memory_space<vmem>>, vector<4x1xf32>
    %23 = vector.broadcast %22 : vector<4x1xf32> to vector<4x256xf32>
    %24 = arith.addf %21, %23 : vector<4x256xf32>
    %c0_18 = arith.constant 0 : index
    %c0_19 = arith.constant 0 : index
    %c0_20 = arith.constant 0 : index
    %25 = vector.load %arg7[%c0_18, %c0_19, %c0_20] : memref<1x4x256xf32, #tpu.memory_space<vmem>>, vector<1x4x256xf32>
    %26 = vector.shape_cast %25 : vector<1x4x256xf32> to vector<4x256xf32>
    %27 = vector.shape_cast %24 : vector<4x256xf32> to vector<1x4x256xf32>
    tpu.vector_store %arg7[%c0_18, %c0_19, %c0_20], %27 {strides = array<i32>} : memref<1x4x256xf32, #tpu.memory_space<vmem>>, vector<1x4x256xf32>,
    return
  }
  func.func @transform_0(%arg0: i32, %arg1: i32) -> (i32, i32, i32) {
    %c0_i32 = arith.constant 0 : i32
    %c0_i32_0 = arith.constant 0 : i32
    return %arg0, %c0_i32, %arg1 : i32, i32, i32
  }
  func.func @transform_1(%arg0: i32, %arg1: i32) -> (i32, i32) {
    %c0_i32 = arith.constant 0 : i32
    %c0_i32_0 = arith.constant 0 : i32
    %c0_i32_1 = arith.constant 0 : i32
    return %c0_i32, %c0_i32_0 : i32, i32
  }
  func.func @transform_2(%arg0: i32, %arg1: i32) -> (i32, i32) {
    %c0_i32 = arith.constant 0 : i32
    %c0_i32_0 = arith.constant 0 : i32
    %c0_i32_1 = arith.constant 0 : i32
    return %c0_i32, %c0_i32_0 : i32, i32
  }
  func.func @transform_3(%arg0: i32, %arg1: i32) -> (i32, i32) {
    %c0_i32 = arith.constant 0 : i32
    %c0_i32_0 = arith.constant 0 : i32
    %c0_i32_1 = arith.constant 0 : i32
    return %c0_i32, %c0_i32_0 : i32, i32
  }
  func.func @transform_4(%arg0: i32, %arg1: i32) -> (i32, i32) {
    %c0_i32 = arith.constant 0 : i32
    %c0_i32_0 = arith.constant 0 : i32
    %c0_i32_1 = arith.constant 0 : i32
    return %c0_i32, %c0_i32_0 : i32, i32
  }
  func.func @transform_5(%arg0: i32, %arg1: i32) -> (i32, i32, i32) {
    %c0_i32 = arith.constant 0 : i32
    %c0_i32_0 = arith.constant 0 : i32
    return %arg0, %c0_i32, %arg1 : i32, i32, i32
  }
}

</mosaic_0001>

<bundles_post_ra>
// kernel: tpu_custom_call.1
= control target key start
LH: loop header
LB: loop body
LE: loop exit
PB: predicated region body
PF: predicated region fallthrough
CT: control target
= control target key end

     0   :  { %10 = vsyncpa [#allocation3], 0  ;;  %s1623_s0 = inlined_call_operand.vmem [shape: f32[2,4,256], index: 0, kind: input, shape index: {}]   ;;  %s1624_s1 = inlined_call_operand.vmem [shape: f32[64,4], index: 1, kind: input, shape index: {}]   ;;  %s1625_s2 = inlined_call_operand.vmem [shape: f32[128,64], index: 2, kind: input, shape index: {}]   ;;  %s1626_s3 = inlined_call_operand.vmem [shape: f32[4,128], index: 3, kind: input, shape index: {}]   ;;  %s1627_s4 = inlined_call_operand.vmem [shape: f32[196,1], index: 4, kind: input, shape index: {}]   ;;  %s1628_s5 = inlined_call_operand.hbm [shape: f32[2,4,256], index: 5, kind: output, shape index: {}]  }
   0x1   :  { %12 = vsyncpa [#allocation3 + $0x1], 0  ;;  %s1312_s18 = smov 0   ;;  %s1314_s19 = smov 0  }
   0x2   :  { %s1316_s20 = smov 0   ;;  %s1318_s21 = smov 0  }
   0x3   :  { %s1320_s22 = smov 0   ;;  %s1322_s23 = smov 0  }
   0x4 LB: > { %s1050_s24 = sadd.s32 4294967295, %s1277_s23   ;;  %s1051_s25 = sadd.s32 4294967294, %s1277_s23   ;;  %s1277_s23 = sphi %s1322_s23, %s18_s23   ;;  %s1273_s22 = sphi %s1320_s22, %s1635_s22   ;;  %s1269_s21 = sphi %s1318_s21, %s1634_s21   ;;  %s1265_s20 = sphi %s1316_s20, %s1633_s20   ;;  %s1261_s19 = sphi %s1314_s19, %s1632_s19   ;;  %s1257_s18 = sphi %s1312_s18, %s1631_s18  }
   0x5   : > { %s30_s26 = sadd.s32 1, %s1273_s22  ;;  %s151_s27 = sadd.s32 1, %s1265_s20 }
   0x6   : > { %p32_p0 = scmp.ge.s32.totalorder %s30_s26, 2  ;;  %p161_p1 = scmp.ne.s32.totalorder %s1265_s20, %s1261_s19 }
   0x7   : > { %p162_p2 = scmp.eq.s32.totalorder %s1050_s24, 1  ;;  %p167_p3 = scmp.ne.s32.totalorder %s1261_s19, %s1257_s18 }
   0x8   : > { %s1637_s26 = smov (%p32_p0, %s30_s26), 0  ;;  %p168_p5 = scmp.eq.s32.totalorder %s1051_s25, 1 }
   0x9   : > { %p1352_p4 = por %p162_p2, %p161_p1  ;;  %s146_s29 = ssub.s32 %s1273_s22, %s1637_s26 }
   0xa   : > { %p1054_p6 = scmp.ge.s32.totalorder %s1277_s23, 1  ;;  %p149_p7 = scmp.eq.s32.totalorder %s146_s29, 0 }
   0xb   : > { %p1359_p8 = por %p168_p5, %p167_p3  ;;  %p211_p9 = scmp.lt.s32.totalorder %s1277_s23, 3 }
   0xc   : > { %s1365_s6 = scalar_select %p149_p7, %s1265_s20, %s151_s27  }
   0xd   : > { %p212_p10 = pnand %p1054_p6, %p211_p9 }
   0xe   : > { %p244_p11 = scmp.lt.s32.totalorder (!%p212_p10), %s1269_s21, 1  ;;  %v1279_v0 = vmov (!%p212_p10), 0.0   ;;  %v1280_v1 = vmov (!%p212_p10), 0   ;;  %v263_v2 = vld [vmem:[%s1627_s4] sm:$0xff] (!%p212_p10)  ;;  %v265_v3 = vld [vmem:[%s1627_s4 + $0x10] sm:$0xff] (!%p212_p10)  ;;  %v264_v4 = vld [vmem:[%s1627_s4 + $0x8] sm:$0xff] (!%p212_p10) }
   0xf   : > { %215 = sbr.rel (%p212_p10) target bundleno = 800 (0x320), region = 40  ;;  %407 = vmatprep.mubr.f32.mxu0 (!%p212_p10), %v1279_v0  ;;  %713 = vmatprep.mubr.f32.mxu1 (!%p212_p10), %v1279_v0  ;;  %v266_v5 = vld [vmem:[%s1627_s4 + $0x18] sm:$0xff] (!%p212_p10)  ;;  %vm338_vm0 = vcmask (!%p212_p10), 1043456   ;;  %v255_v8 = vld [vmem:[%s1624_s1] sm:$0xff] (!%p212_p10)  ;;  %vm313_vm1 = vcmask (!%p212_p10), 31744   ;;  %v268_v10 = vld [vmem:[%s1627_s4 + $0x28] sm:$0xff] (!%p212_p10) }
  0x10   : > { %1196 = vset.pattern.permute.xlu0 (!%p212_p10), %v1280_v1  ;;  %1197 = vset.pattern.permute.xlu1 (!%p212_p10), %v1280_v1  ;;  %v267_v9 = vld [vmem:[%s1627_s4 + $0x20] sm:$0xff] (!%p212_p10)  ;;  %v256_v11 = vld [vmem:[%s1624_s1 + $0x8] sm:$0xff] (!%p212_p10)  ;;  %v269_v12 = vld [vmem:[%s1627_s4 + $0x30] sm:$0xff] (!%p212_p10)  ;;  %vm600_vm2 = vcmask (!%p212_p10), 523264   ;;  %s1090_s9 = sshll.u32 (!%p212_p10), %s1269_s21, 7 }
  0x11   : > { %273 = vperm.xlu0 (!%p212_p10), %1196, %v263_v2   ;;  %283 = vperm.xlu1 (!%p212_p10), %1197, %v265_v3   ;;  %v270_v13 = vld [vmem:[%s1627_s4 + $0x38] sm:$0xff] (!%p212_p10)  ;;  %v257_v14 = vld [vmem:[%s1624_s1 + $0x10] sm:$0xff] (!%p212_p10)  ;;  %v504_v15 = vld [vmem:[%s1627_s4 + $0x40] sm:$0xff] (!%p212_p10)  ;;  %s1576_s14 = scalar_lea.hbm (!%p212_p10), %s1628_s5, %s1090_s9 }
  0x12   : > { %v505_v16 = vld [vmem:[%s1627_s4 + $0x48] sm:$0xff] (!%p212_p10)  ;;  %v258_v17 = vld [vmem:[%s1624_s1 + $0x18] sm:$0xff] (!%p212_p10)  ;;  %v506_v18 = vld [vmem:[%s1627_s4 + $0x50] sm:$0xff] (!%p212_p10) }
  0x13   : > { %v507_v19 = vld [vmem:[%s1627_s4 + $0x58] sm:$0xff] (!%p212_p10)  ;;  %v259_v20 = vld [vmem:[%s1624_s1 + $0x20] sm:$0xff] (!%p212_p10)  ;;  %v509_v22 = vld [vmem:[%s1627_s4 + $0x68] sm:$0xff] (!%p212_p10) }
  0x14   : > { %v508_v21 = vld [vmem:[%s1627_s4 + $0x60] sm:$0xff] (!%p212_p10)  ;;  %v260_v23 = vld [vmem:[%s1624_s1 + $0x28] sm:$0xff] (!%p212_p10)  ;;  %v510_v24 = vld [vmem:[%s1627_s4 + $0x70] sm:$0xff] (!%p212_p10) }
  0x15   : > { %278 = vperm.xlu0 (!%p212_p10), %1196, %v264_v4   ;;  %288 = vperm.xlu1 (!%p212_p10), %1197, %v266_v5   ;;  %v511_v25 = vld [vmem:[%s1627_s4 + $0x78] sm:$0xff] (!%p212_p10)  ;;  %v261_v26 = vld [vmem:[%s1624_s1 + $0x30] sm:$0xff] (!%p212_p10)  ;;  %v512_v27 = vld [vmem:[%s1627_s4 + $0x80] sm:$0xff] (!%p212_p10) }
  0x16   : > { %s245_s7 = scalar_select %p244_p11, %s1269_s21, 1  ;;  %v513_v28 = vld [vmem:[%s1627_s4 + $0x88] sm:$0xff]  ;;  %v262_v29 = vld [vmem:[%s1624_s1 + $0x38] sm:$0xff]  ;;  %v514_v30 = vld [vmem:[%s1627_s4 + $0x90] sm:$0xff] }
  0x17   : > { %v515_v31 = vld [vmem:[%s1627_s4 + $0x98] sm:$0xff]  ;;  %v516_v32 = vld [vmem:[%s1627_s4 + $0xa0] sm:$0xff]  ;;  %v517_v33 = vld [vmem:[%s1627_s4 + $0xa8] sm:$0xff]  ;;  %s1281_s21 = smov [#allocation2]  }
  0x18   : > { %s1089_s12 = sshll.u32 %s245_s7, 3  ;;  %v518_v34 = vld [vmem:[%s1627_s4 + $0xb0] sm:$0xff]  ;;  %v519_v35 = vld [vmem:[%s1627_s4 + $0xb8] sm:$0xff]  ;;  %v875_v36 = vld [vmem:[%s1627_s4 + $0xc0] sm:$0xf]  ;;  %s240_s7 = sand.u32 1, %s1261_s19  }
  0x19   : > { %s251_s15 = scalar_lea.vmem %s1623_s0, %s1089_s12  ;;  %293 = vperm.xlu0 %1196, %v267_v9   ;;  %298 = vperm.xlu1 %1197, %v268_v10   ;;  %s1055_s8 = sshll.u32 %s240_s7, 3 }
  0x1a   : > { %v254_v6 = vld [vmem:[%s251_s15] sm:$0xff]  ;;  %s242_s10 = scalar_lea.vmem [#allocation2], %s1055_s8  ;;  %s958_s15 = scalar_lea.sflag [#allocation3], %s240_s7 }
  0x1b   : > { %v312_v7 = vcombine.high %v254_v6, %v254_v6  ;;  %s974_s11 = sshll.u32 %s242_s10, 4  ;;  %s1203_s17 = sshll.u32 %s1281_s21, 4  ;;  %s1578_s11 = int_to_ptr.vmem [resolvable:$true] %s974_s11  ;;  %s1204_s17 = int_to_ptr.vmem [resolvable:$false] %s1203_s17 }
  0x1c   : > { %s1199_s16 = scalar_lea.vmem %s1578_s11, 128  ;;  %s1205_s24 = scalar_lea.vmem %s1204_s17, 256 }
  0x1d   : > { %1058 = vmatprep.subr.msk.mxu0 %vm338_vm0, %v312_v7  ;;  %303 = vperm.xlu0 %1196, %v269_v12   ;;  %p1200_p12 = scmp.ne.s32.totalorder %s1578_s11, %s1199_s16  ;;  %p1206_p1 = scmp.lt.s32.totalorder %s1578_s11, %s1204_s17 }
  0x1e   : > { %1059 = vmatpush1.msk.msra.mxu0 %vm338_vm0, %v254_v6  ;;  %308 = vperm.xlu1 %1197, %v270_v13   ;;  %p1207_p2 = scmp.lt.s32.totalorder %s1205_s24, %s1199_s16 }
  0x1f   : > { %1060 = vmatmul.mubr.msk.f32.vlgmr.msra.gmra.mrb[0].mxu0 %vm313_vm1, %v255_v8  ;;  %p1201_p13 = pnand %p1200_p12, %p1352_p4 }
  0x20   : > { %413 = vmatprep.mubr.f32.mxu0 %v1279_v0  ;;  %p1208_p3 = por %p1207_p2, %p1206_p1 }
  0x21   : > { %522 = vperm.xlu0 %1196, %v504_v15   ;;  %p1202_p0 = pneg %p1201_p13 }
  0x22   : > { %527 = vperm.xlu1 %1197, %v505_v16  }
  0x23   : > { %1061 = vmatmul.mubr.msk.f32.gmra.mrb[2].mxu0 %vm313_vm1, %v256_v11  ;;  %p1209_p5 = pnand %p1208_p3, %p1202_p0 }
  0x24   : > { %419 = vmatprep.mubr.f32.mxu0 %v1279_v0 }
  0x25   : > { %532 = vperm.xlu0 %1196, %v506_v18  }
  0x26   : > { %537 = vperm.xlu1 %1197, %v507_v19  }
  0x27   : > { %1062 = vmatmul.mubr.msk.f32.gmra.mrb[4].mxu0 %vm313_vm1, %v257_v14 }
  0x28   : > { %425 = vmatprep.mubr.f32.mxu0 %v1279_v0 }
  0x29   : > { %542 = vperm.xlu0 %1196, %v508_v21  }
  0x2a   : > { %547 = vperm.xlu1 %1197, %v509_v22  }
  0x2b   : > { %1063 = vmatmul.mubr.msk.f32.gmra.mrb[6].mxu0 %vm313_vm1, %v258_v17 }
  0x2c   : > { %431 = vmatprep.mubr.f32.mxu0 %v1279_v0 }
  0x2d   : > { %552 = vperm.xlu0 %1196, %v510_v24  }
  0x2e   : > { %557 = vperm.xlu1 %1197, %v511_v25  }
  0x2f   : > { %1064 = vmatmul.mubr.msk.f32.gmra.mrb[8].mxu0 %vm313_vm1, %v259_v20 }
  0x30   : > { %437 = vmatprep.mubr.f32.mxu0 %v1279_v0 }
  0x31   : > { %562 = vperm.xlu0 %1196, %v512_v27  }
  0x32   : > { %567 = vperm.xlu1 %1197, %v513_v28  }
  0x33   : > { %1065 = vmatmul.mubr.msk.f32.gmra.mrb[10].mxu0 %vm313_vm1, %v260_v23 }
  0x34   : > { %443 = vmatprep.mubr.f32.mxu0 %v1279_v0 }
  0x35   : > { %572 = vperm.xlu0 %1196, %v514_v30  }
  0x36   : > { %577 = vperm.xlu1 %1197, %v515_v31  }
  0x37   : > { %1066 = vmatmul.mubr.msk.f32.gmra.mrb[12].mxu0 %vm313_vm1, %v261_v26 }
  0x38   : > { %449 = vmatprep.mubr.f32.mxu0 %v1279_v0 }
  0x39   : > { %582 = vperm.xlu0 %1196, %v516_v32  }
  0x3a   : > { %587 = vperm.xlu1 %1197, %v517_v33  }
  0x3b   : > { %1067 = vmatmul.mubr.msk.f32.gmra.mrb[14].mxu0 %vm313_vm1, %v262_v29 }
  0x3c   : > { %945 = vmatprep.mubr.f32.mxu0 %v1279_v0 }
  0x3d   : > { %592 = vperm.xlu0 %1196, %v518_v34  }
  0x3e   : > { %597 = vperm.xlu1 %1197, %v519_v35  }
  0x41   : > { %878 = vperm.xlu0 %1196, %v875_v36  }
  0x90   : > { %v274_v37 = vpop.permute.xlu0 %273  ;;  %v284_v47 = vpop.permute.xlu1 %283 }
  0x94   : > { %v279_v42 = vpop.permute.xlu0 %278  ;;  %v289_v61 = vpop.permute.xlu1 %288 }
  0x98   : > { %v294_v7 = vpop.permute.xlu0 %293  ;;  %v299_v18 = vpop.permute.xlu1 %298 }
  0x9c   : > { %v304_v27 = vpop.permute.xlu0 %303 }
  0xf2   : > { %v409_v38 = vpop.f32.mrb[0].mxu0 }
  0xf3   : > { %v410_v39 = vadd.f32 %v409_v38, %v274_v37  ;;  %v411_v40 = vpop.f32.mrb[1].mxu0  ;;  %v309_v38 = vpop.permute.xlu1 %308 }
  0xf4   : > { %v412_v41 = vadd.f32 %v411_v40, %v274_v37 }
  0xf5   : > { %v456_v44 = vmax.f32 %v410_v39, 0.0 }
  0xf6   : > { %v415_v43 = vpop.f32.mrb[2].mxu0  ;;  %v457_v48 = vmax.f32 %v412_v41, 0.0 }
  0xf7   : > { %v416_v45 = vadd.f32 %v415_v43, %v279_v42  ;;  %v417_v46 = vpop.f32.mrb[3].mxu0  ;;  %v472_v53 = vmin.f32 %v456_v44, 6.0 }
  0xf8   : > { %v418_v49 = vadd.f32 %v417_v46, %v279_v42  ;;  %v473_v57 = vmin.f32 %v457_v48, 6.0 }
  0xf9   : > { %v458_v50 = vmax.f32 %v416_v45, 0.0 }
  0xfa   : > { %v459_v51 = vmax.f32 %v418_v49, 0.0  ;;  %v421_v52 = vpop.f32.mrb[4].mxu0 }
  0xfb   : > { %v474_v54 = vmin.f32 %v458_v50, 6.0  ;;  %v422_v55 = vadd.f32 %v421_v52, %v284_v47  ;;  %v423_v56 = vpop.f32.mrb[5].mxu0 }
  0xfc   : > { %v475_v58 = vmin.f32 %v459_v51, 6.0  ;;  %v424_v59 = vadd.f32 %v423_v56, %v284_v47  ;;  %v490_v56 = vld [vmem:[%s1625_s2 + $0x10] sm:$0xff] }
  0xfd   : > { %v1093_v60 = vpack.c.bf16 %v474_v54, %v472_v53  ;;  %v460_v1 = vmax.f32 %v422_v55, 0.0  ;;  %v488_v54 = vld [vmem:[%s1625_s2] sm:$0xff]  ;;  %v489_v55 = vld [vmem:[%s1625_s2 + $0x8] sm:$0xff] }
  0xfe   : > { %v427_v62 = vpop.f32.mrb[6].mxu0  ;;  %v1091_v63 = vpack.c.bf16 %v475_v58, %v473_v57  ;;  %v461_v4 = vmax.f32 %v424_v59, 0.0  ;;  %v491_v57 = vld [vmem:[%s1625_s2 + $0x18] sm:$0xff]  ;;  %v492_v58 = vld [vmem:[%s1625_s2 + $0x20] sm:$0xff]  ;;  %v493_v59 = vld [vmem:[%s1625_s2 + $0x28] sm:$0xff] }
  0xff   : > { %v428_v2 = vadd.f32 %v427_v62, %v289_v61  ;;  %v429_v3 = vpop.f32.mrb[7].mxu0  ;;  %v476_v10 = vmin.f32 %v460_v1, 6.0  ;;  %v496_v62 = vld [vmem:[%s1625_s2 + $0x40] sm:$0xff]  ;;  %v498_v1 = vld [vmem:[%s1625_s2 + $0x50] sm:$0xff] }
 0x100   : > { %v430_v5 = vadd.f32 %v429_v3, %v289_v61  ;;  %1092 = vmatprep.subr.bf16.mxu1 %v1091_v63  ;;  %v477_v14 = vmin.f32 %v461_v4, 6.0  ;;  %v495_v61 = vld [vmem:[%s1625_s2 + $0x38] sm:$0xff]  ;;  %v497_v63 = vld [vmem:[%s1625_s2 + $0x48] sm:$0xff]  ;;  %v500_v3 = vld [vmem:[%s1625_s2 + $0x60] sm:$0xff] }
 0x101   : > { %v462_v6 = vmax.f32 %v428_v2, 0.0  ;;  %1094 = vmatpush1.bf16.msra.mxu1 %v1093_v60  ;;  %v494_v60 = vld [vmem:[%s1625_s2 + $0x30] sm:$0xff]  ;;  %v499_v2 = vld [vmem:[%s1625_s2 + $0x58] sm:$0xff]  ;;  %v501_v4 = vld [vmem:[%s1625_s2 + $0x68] sm:$0xff] }
 0x102   : > { %v463_v8 = vmax.f32 %v430_v5, 0.0  ;;  %v433_v9 = vpop.f32.mrb[8].mxu0  ;;  %v502_v5 = vld [vmem:[%s1625_s2 + $0x70] sm:$0xff] }
 0x103   : > { %v478_v11 = vmin.f32 %v462_v6, 6.0  ;;  %v434_v12 = vadd.f32 %v433_v9, %v294_v7  ;;  %v435_v13 = vpop.f32.mrb[9].mxu0  ;;  %v503_v6 = vld [vmem:[%s1625_s2 + $0x78] sm:$0xff] }
 0x104   : > { %v479_v15 = vmin.f32 %v463_v8, 6.0  ;;  %v436_v16 = vadd.f32 %v435_v13, %v294_v7  ;;  %v523_v7 = vpop.permute.xlu0 %522 }
 0x105   : > { %v1097_v17 = vpack.c.bf16 %v478_v11, %v476_v10  ;;  %v464_v21 = vmax.f32 %v434_v12, 0.0  ;;  %v528_v12 = vpop.permute.xlu1 %527 }
 0x106   : > { %v1095_v19 = vpack.c.bf16 %v479_v15, %v477_v14  ;;  %v439_v20 = vpop.f32.mrb[10].mxu0  ;;  %v465_v24 = vmax.f32 %v436_v16, 0.0 }
 0x107   : > { %v440_v22 = vadd.f32 %v439_v20, %v299_v18  ;;  %v441_v23 = vpop.f32.mrb[11].mxu0  ;;  %v480_v30 = vmin.f32 %v464_v21, 6.0 }
 0x108   : > { %v442_v25 = vadd.f32 %v441_v23, %v299_v18  ;;  %1096 = vmatprep.subr.bf16.mxu1 %v1095_v19  ;;  %v481_v34 = vmin.f32 %v465_v24, 6.0 }
 0x109   : > { %v466_v26 = vmax.f32 %v440_v22, 0.0  ;;  %1098 = vmatpush1.bf16.msra.mxu1 %v1097_v17 }
 0x10a   : > { %v467_v28 = vmax.f32 %v442_v25, 0.0  ;;  %v445_v29 = vpop.f32.mrb[12].mxu0 }
 0x10b   : > { %v482_v31 = vmin.f32 %v466_v26, 6.0  ;;  %v446_v32 = vadd.f32 %v445_v29, %v304_v27  ;;  %v447_v33 = vpop.f32.mrb[13].mxu0 }
 0x10c   : > { %v483_v35 = vmin.f32 %v467_v28, 6.0  ;;  %v448_v36 = vadd.f32 %v447_v33, %v304_v27 }
 0x10d   : > { %v1101_v37 = vpack.c.bf16 %v482_v31, %v480_v30  ;;  %v468_v41 = vmax.f32 %v446_v32, 0.0  ;;  %v538_v30 = vpop.permute.xlu1 %537 }
 0x10e   : > { %v1099_v39 = vpack.c.bf16 %v483_v35, %v481_v34  ;;  %v451_v40 = vpop.f32.mrb[14].mxu0  ;;  %v469_v44 = vmax.f32 %v448_v36, 0.0 }
 0x10f   : > { %v452_v42 = vadd.f32 %v451_v40, %v309_v38  ;;  %v453_v43 = vpop.f32.mrb[15].mxu0  ;;  %v484_v48 = vmin.f32 %v468_v41, 6.0 }
 0x110   : > { %v454_v45 = vadd.f32 %v453_v43, %v309_v38  ;;  %1100 = vmatprep.subr.bf16.mxu1 %v1099_v39  ;;  %v485_v50 = vmin.f32 %v469_v44, 6.0 }
 0x111   : > { %v470_v46 = vmax.f32 %v452_v42, 0.0  ;;  %1102 = vmatpush1.bf16.msra.mxu1 %v1101_v37 }
 0x112   : > { %v471_v47 = vmax.f32 %v454_v45, 0.0 }
 0x113   : > { %v486_v49 = vmin.f32 %v470_v46, 6.0 }
 0x114   : > { %v487_v51 = vmin.f32 %v471_v47, 6.0 }
 0x115   : > { %v1105_v52 = vpack.c.bf16 %v486_v49, %v484_v48 }
 0x116   : > { %v1103_v53 = vpack.c.bf16 %v487_v51, %v485_v50  ;;  %v548_v50 = vpop.permute.xlu1 %547 }
 0x118   : > { %1104 = vmatprep.subr.bf16.mxu1 %v1103_v53 }
 0x119   : > { %1106 = vmatpush1.bf16.msra.mxu1 %v1105_v52 }
 0x11c   : > { %1068 = vmatmul.mubr.msk.f32.vlgmr.msra.gmra.mrb[0].mxu1 %vm600_vm2, %v488_v54 }
 0x11d   : > { %719 = vmatprep.mubr.f32.mxu1 %v1279_v0 }
 0x120   : > { %1069 = vmatmul.mubr.msk.f32.gmra.mrb[2].mxu1 %vm600_vm2, %v489_v55 }
 0x121   : > { %725 = vmatprep.mubr.f32.mxu1 %v1279_v0 }
 0x124   : > { %1070 = vmatmul.mubr.msk.f32.gmra.mrb[4].mxu1 %vm600_vm2, %v490_v56 }
 0x125   : > { %731 = vmatprep.mubr.f32.mxu1 %v1279_v0 }
 0x128   : > { %1071 = vmatmul.mubr.msk.f32.gmra.mrb[6].mxu1 %vm600_vm2, %v491_v57 }
 0x129   : > { %737 = vmatprep.mubr.f32.mxu1 %v1279_v0 }
 0x12c   : > { %1072 = vmatmul.mubr.msk.f32.gmra.mrb[8].mxu1 %vm600_vm2, %v492_v58 }
 0x12d   : > { %743 = vmatprep.mubr.f32.mxu1 %v1279_v0 }
 0x130   : > { %1073 = vmatmul.mubr.msk.f32.gmra.mrb[10].mxu1 %vm600_vm2, %v493_v59 }
 0x131   : > { %749 = vmatprep.mubr.f32.mxu1 %v1279_v0 }
 0x134   : > { %1074 = vmatmul.mubr.msk.f32.gmra.mrb[12].mxu1 %vm600_vm2, %v494_v60 }
 0x135   : > { %755 = vmatprep.mubr.f32.mxu1 %v1279_v0 }
 0x138   : > { %1075 = vmatmul.mubr.msk.f32.gmra.mrb[14].mxu1 %vm600_vm2, %v495_v61 }
 0x139   : > { %761 = vmatprep.mubr.f32.mxu1 %v1279_v0 }
 0x13c   : > { %1076 = vmatmul.mubr.msk.f32.gmra.mrb[16].mxu1 %vm600_vm2, %v496_v62 }
 0x13d   : > { %767 = vmatprep.mubr.f32.mxu1 %v1279_v0 }
 0x140   : > { %1077 = vmatmul.mubr.msk.f32.gmra.mrb[18].mxu1 %vm600_vm2, %v497_v63 }
 0x141   : > { %773 = vmatprep.mubr.f32.mxu1 %v1279_v0 }
 0x144   : > { %1078 = vmatmul.mubr.msk.f32.gmra.mrb[20].mxu1 %vm600_vm2, %v498_v1 }
 0x145   : > { %779 = vmatprep.mubr.f32.mxu1 %v1279_v0 }
 0x148   : > { %1079 = vmatmul.mubr.msk.f32.gmra.mrb[22].mxu1 %vm600_vm2, %v499_v2 }
 0x149   : > { %785 = vmatprep.mubr.f32.mxu1 %v1279_v0 }
 0x14c   : > { %1080 = vmatmul.mubr.msk.f32.gmra.mrb[24].mxu1 %vm600_vm2, %v500_v3 }
 0x14d   : > { %791 = vmatprep.mubr.f32.mxu1 %v1279_v0 }
 0x150   : > { %1081 = vmatmul.mubr.msk.f32.gmra.mrb[26].mxu1 %vm600_vm2, %v501_v4 }
 0x151   : > { %797 = vmatprep.mubr.f32.mxu1 %v1279_v0 }
 0x154   : > { %1082 = vmatmul.mubr.msk.f32.gmra.mrb[28].mxu1 %vm600_vm2, %v502_v5 }
 0x155   : > { %803 = vmatprep.mubr.f32.mxu1 %v1279_v0  ;;  %v533_v0 = vpop.permute.xlu0 %532 }
 0x158   : > { %1083 = vmatmul.mubr.msk.f32.gmra.mrb[30].mxu1 %vm600_vm2, %v503_v6 }
 0x159   : > { %v543_v39 = vpop.permute.xlu0 %542 }
 0x15d   : > { %v553_v59 = vpop.permute.xlu0 %552 }
 0x1ef   : > { %v715_v8 = vpop.f32.mrb[0].mxu1 }
 0x1f0   : > { %v716_v9 = vadd.f32 %v715_v8, %v523_v7  ;;  %v717_v10 = vpop.f32.mrb[1].mxu1 }
 0x1f1   : > { %v718_v11 = vadd.f32 %v717_v10, %v523_v7  ;;  %v558_v7 = vpop.permute.xlu1 %557 }
 0x1f2   : > { %v810_v14 = vmax.f32 %v716_v9, 0.0 }
 0x1f3   : > { %v721_v13 = vpop.f32.mrb[2].mxu1  ;;  %v811_v17 = vmax.f32 %v718_v11, 0.0 }
 0x1f4   : > { %v722_v15 = vadd.f32 %v721_v13, %v528_v12  ;;  %v723_v16 = vpop.f32.mrb[3].mxu1  ;;  %v842_v22 = vmin.f32 %v810_v14, 6.0 }
 0x1f5   : > { %v724_v18 = vadd.f32 %v723_v16, %v528_v12  ;;  %v843_v26 = vmin.f32 %v811_v17, 6.0  ;;  %v563_v16 = vpop.permute.xlu0 %562 }
 0x1f6   : > { %v812_v19 = vmax.f32 %v722_v15, 0.0 }
 0x1f7   : > { %v813_v20 = vmax.f32 %v724_v18, 0.0  ;;  %v727_v21 = vpop.f32.mrb[4].mxu1 }
 0x1f8   : > { %v844_v23 = vmin.f32 %v812_v19, 6.0  ;;  %v728_v24 = vadd.f32 %v727_v21, %v533_v0  ;;  %v729_v25 = vpop.f32.mrb[5].mxu1 }
 0x1f9   : > { %v845_v27 = vmin.f32 %v813_v20, 6.0  ;;  %v730_v28 = vadd.f32 %v729_v25, %v533_v0 }
 0x1fa   : > { %v1109_v29 = vpack.c.bf16 %v844_v23, %v842_v22  ;;  %v814_v33 = vmax.f32 %v728_v24, 0.0 }
 0x1fb   : > { %v1107_v31 = vpack.c.bf16 %v845_v27, %v843_v26  ;;  %v733_v32 = vpop.f32.mrb[6].mxu1  ;;  %v815_v36 = vmax.f32 %v730_v28, 0.0  ;;  %v568_v26 = vpop.permute.xlu1 %567 }
 0x1fc   : > { %v734_v34 = vadd.f32 %v733_v32, %v538_v30  ;;  %v735_v35 = vpop.f32.mrb[7].mxu1  ;;  %v846_v42 = vmin.f32 %v814_v33, 6.0 }
 0x1fd   : > { %v736_v37 = vadd.f32 %v735_v35, %v538_v30  ;;  %1108 = vmatprep.subr.bf16.mxu0 %v1107_v31  ;;  %v847_v46 = vmin.f32 %v815_v36, 6.0  ;;  %v573_v35 = vpop.permute.xlu0 %572 }
 0x1fe   : > { %v816_v38 = vmax.f32 %v734_v34, 0.0  ;;  %1110 = vmatpush1.bf16.msra.mxu0 %v1109_v29 }
 0x1ff   : > { %v817_v40 = vmax.f32 %v736_v37, 0.0  ;;  %v739_v41 = vpop.f32.mrb[8].mxu1 }
 0x200   : > { %v848_v43 = vmin.f32 %v816_v38, 6.0  ;;  %v740_v44 = vadd.f32 %v739_v41, %v543_v39  ;;  %v741_v45 = vpop.f32.mrb[9].mxu1 }
 0x201   : > { %v849_v47 = vmin.f32 %v817_v40, 6.0  ;;  %v742_v48 = vadd.f32 %v741_v45, %v543_v39 }
 0x202   : > { %v1113_v49 = vpack.c.bf16 %v848_v43, %v846_v42  ;;  %v818_v53 = vmax.f32 %v740_v44, 0.0 }
 0x203   : > { %v1111_v51 = vpack.c.bf16 %v849_v47, %v847_v46  ;;  %v745_v52 = vpop.f32.mrb[10].mxu1  ;;  %v819_v56 = vmax.f32 %v742_v48, 0.0  ;;  %v578_v46 = vpop.permute.xlu1 %577 }
 0x204   : > { %v746_v54 = vadd.f32 %v745_v52, %v548_v50  ;;  %v747_v55 = vpop.f32.mrb[11].mxu1  ;;  %v850_v62 = vmin.f32 %v818_v53, 6.0 }
 0x205   : > { %v748_v57 = vadd.f32 %v747_v55, %v548_v50  ;;  %1112 = vmatprep.subr.bf16.mxu0 %v1111_v51  ;;  %v851_v3 = vmin.f32 %v819_v56, 6.0  ;;  %v583_v55 = vpop.permute.xlu0 %582 }
 0x206   : > { %v820_v58 = vmax.f32 %v746_v54, 0.0  ;;  %1114 = vmatpush1.bf16.msra.mxu0 %v1113_v49 }
 0x207   : > { %v821_v60 = vmax.f32 %v748_v57, 0.0  ;;  %v751_v61 = vpop.f32.mrb[12].mxu1 }
 0x208   : > { %v852_v63 = vmin.f32 %v820_v58, 6.0  ;;  %v752_v1 = vadd.f32 %v751_v61, %v553_v59  ;;  %v753_v2 = vpop.f32.mrb[13].mxu1 }
 0x209   : > { %v853_v4 = vmin.f32 %v821_v60, 6.0  ;;  %v754_v5 = vadd.f32 %v753_v2, %v553_v59 }
 0x20a   : > { %v1117_v6 = vpack.c.bf16 %v852_v63, %v850_v62  ;;  %v822_v10 = vmax.f32 %v752_v1, 0.0 }
 0x20b   : > { %v1115_v8 = vpack.c.bf16 %v853_v4, %v851_v3  ;;  %v757_v9 = vpop.f32.mrb[14].mxu1  ;;  %v823_v13 = vmax.f32 %v754_v5, 0.0  ;;  %v588_v3 = vpop.permute.xlu1 %587 }
 0x20c   : > { %v758_v11 = vadd.f32 %v757_v9, %v558_v7  ;;  %v759_v12 = vpop.f32.mrb[15].mxu1  ;;  %v854_v19 = vmin.f32 %v822_v10, 6.0 }
 0x20d   : > { %v760_v14 = vadd.f32 %v759_v12, %v558_v7  ;;  %1116 = vmatprep.subr.bf16.mxu0 %v1115_v8  ;;  %v855_v22 = vmin.f32 %v823_v13, 6.0  ;;  %v593_v12 = vpop.permute.xlu0 %592 }
 0x20e   : > { %v824_v15 = vmax.f32 %v758_v11, 0.0  ;;  %1118 = vmatpush1.bf16.msra.mxu0 %v1117_v6 }
 0x20f   : > { %v825_v17 = vmax.f32 %v760_v14, 0.0  ;;  %v763_v18 = vpop.f32.mrb[16].mxu1 }
 0x210   : > { %v856_v0 = vmin.f32 %v824_v15, 6.0  ;;  %v764_v20 = vadd.f32 %v763_v18, %v563_v16  ;;  %v765_v21 = vpop.f32.mrb[17].mxu1 }
 0x211   : > { %v857_v23 = vmin.f32 %v825_v17, 6.0  ;;  %v766_v24 = vadd.f32 %v765_v21, %v563_v16 }
 0x212   : > { %v1121_v25 = vpack.c.bf16 %v856_v0, %v854_v19  ;;  %v826_v29 = vmax.f32 %v764_v20, 0.0 }
 0x213   : > { %v1119_v27 = vpack.c.bf16 %v857_v23, %v855_v22  ;;  %v769_v28 = vpop.f32.mrb[18].mxu1  ;;  %v827_v32 = vmax.f32 %v766_v24, 0.0  ;;  %v598_v22 = vpop.permute.xlu1 %597 }
 0x214   : > { %v770_v30 = vadd.f32 %v769_v28, %v568_v26  ;;  %v771_v31 = vpop.f32.mrb[19].mxu1  ;;  %v858_v38 = vmin.f32 %v826_v29, 6.0 }
 0x215   : > { %v772_v33 = vadd.f32 %v771_v31, %v568_v26  ;;  %1120 = vmatprep.subr.bf16.mxu0 %v1119_v27  ;;  %v859_v42 = vmin.f32 %v827_v32, 6.0 }
 0x216   : > { %v828_v34 = vmax.f32 %v770_v30, 0.0  ;;  %1122 = vmatpush1.bf16.msra.mxu0 %v1121_v25 }
 0x217   : > { %v829_v36 = vmax.f32 %v772_v33, 0.0  ;;  %v775_v37 = vpop.f32.mrb[20].mxu1 }
 0x218   : > { %v860_v39 = vmin.f32 %v828_v34, 6.0  ;;  %v776_v40 = vadd.f32 %v775_v37, %v573_v35  ;;  %v777_v41 = vpop.f32.mrb[21].mxu1 }
 0x219   : > { %v861_v43 = vmin.f32 %v829_v36, 6.0  ;;  %v778_v44 = vadd.f32 %v777_v41, %v573_v35 }
 0x21a   : > { %v1125_v45 = vpack.c.bf16 %v860_v39, %v858_v38  ;;  %v830_v49 = vmax.f32 %v776_v40, 0.0  ;;  %v874_v38 = vld [vmem:[%s1626_s3] sm:$0xf]  ;;  %v879_v39 = vpop.permute.xlu0 %878 }
 0x21b   : > { %v1123_v47 = vpack.c.bf16 %v861_v43, %v859_v42  ;;  %v781_v48 = vpop.f32.mrb[22].mxu1  ;;  %v831_v52 = vmax.f32 %v778_v44, 0.0 }
 0x21c   : > { %v782_v50 = vadd.f32 %v781_v48, %v578_v46  ;;  %v783_v51 = vpop.f32.mrb[23].mxu1  ;;  %v862_v58 = vmin.f32 %v830_v49, 6.0 }
 0x21d   : > { %v784_v53 = vadd.f32 %v783_v51, %v578_v46  ;;  %1124 = vmatprep.subr.bf16.mxu0 %v1123_v47  ;;  %v863_v62 = vmin.f32 %v831_v52, 6.0 }
 0x21e   : > { %v832_v54 = vmax.f32 %v782_v50, 0.0  ;;  %1126 = vmatpush1.bf16.msra.mxu0 %v1125_v45 }
 0x21f   : > { %v833_v56 = vmax.f32 %v784_v53, 0.0  ;;  %v787_v57 = vpop.f32.mrb[24].mxu1 }
 0x220   : > { %v864_v59 = vmin.f32 %v832_v54, 6.0  ;;  %v788_v60 = vadd.f32 %v787_v57, %v583_v55  ;;  %v789_v61 = vpop.f32.mrb[25].mxu1 }
 0x221   : > { %v865_v63 = vmin.f32 %v833_v56, 6.0  ;;  %v790_v1 = vadd.f32 %v789_v61, %v583_v55 }
 0x222   : > { %v1129_v2 = vpack.c.bf16 %v864_v59, %v862_v58  ;;  %v834_v6 = vmax.f32 %v788_v60, 0.0 }
 0x223   : > { %v1127_v4 = vpack.c.bf16 %v865_v63, %v863_v62  ;;  %v793_v5 = vpop.f32.mrb[26].mxu1  ;;  %v835_v9 = vmax.f32 %v790_v1, 0.0 }
 0x224   : > { %v794_v7 = vadd.f32 %v793_v5, %v588_v3  ;;  %v795_v8 = vpop.f32.mrb[27].mxu1  ;;  %v866_v15 = vmin.f32 %v834_v6, 6.0 }
 0x225   : > { %v796_v10 = vadd.f32 %v795_v8, %v588_v3  ;;  %1128 = vmatprep.subr.bf16.mxu0 %v1127_v4  ;;  %v867_v19 = vmin.f32 %v835_v9, 6.0 }
 0x226   : > { %v836_v11 = vmax.f32 %v794_v7, 0.0  ;;  %1130 = vmatpush1.bf16.msra.mxu0 %v1129_v2 }
 0x227   : > { %v837_v13 = vmax.f32 %v796_v10, 0.0  ;;  %v799_v14 = vpop.f32.mrb[28].mxu1 }
 0x228   : > { %v868_v16 = vmin.f32 %v836_v11, 6.0  ;;  %v800_v17 = vadd.f32 %v799_v14, %v593_v12  ;;  %v801_v18 = vpop.f32.mrb[29].mxu1 }
 0x229   : > { %v869_v0 = vmin.f32 %v837_v13, 6.0  ;;  %v802_v20 = vadd.f32 %v801_v18, %v593_v12 }
 0x22a   : > { %v1133_v21 = vpack.c.bf16 %v868_v16, %v866_v15  ;;  %v838_v25 = vmax.f32 %v800_v17, 0.0 }
 0x22b   : > { %v1131_v23 = vpack.c.bf16 %v869_v0, %v867_v19  ;;  %v805_v24 = vpop.f32.mrb[30].mxu1  ;;  %v839_v28 = vmax.f32 %v802_v20, 0.0 }
 0x22c   : > { %v806_v26 = vadd.f32 %v805_v24, %v598_v22  ;;  %v807_v27 = vpop.f32.mrb[31].mxu1  ;;  %v870_v32 = vmin.f32 %v838_v25, 6.0 }
 0x22d   : > { %v808_v29 = vadd.f32 %v807_v27, %v598_v22  ;;  %1132 = vmatprep.subr.bf16.mxu0 %v1131_v23  ;;  %v871_v34 = vmin.f32 %v839_v28, 6.0 }
 0x22e   : > { %v840_v30 = vmax.f32 %v806_v26, 0.0  ;;  %1134 = vmatpush1.bf16.msra.mxu0 %v1133_v21 }
 0x22f   : > { %v841_v31 = vmax.f32 %v808_v29, 0.0 }
 0x230   : > { %v872_v33 = vmin.f32 %v840_v30, 6.0 }
 0x231   : > { %v873_v35 = vmin.f32 %v841_v31, 6.0 }
 0x232   : > { %v1137_v36 = vpack.c.bf16 %v872_v33, %v870_v32 }
 0x233   : > { %v1135_v37 = vpack.c.bf16 %v873_v35, %v871_v34 }
 0x235   : > { %1136 = vmatprep.subr.bf16.mxu0 %v1135_v37 }
 0x236   : > { %1138 = vmatpush1.bf16.msra.mxu0 %v1137_v36 }
 0x239   : > { %946 = vmatmul.mubr.f32.vlgmr.msra.gmra.mrb[16].mxu0 %v874_v38 }
 0x30c   : > { %v947_v40 = vpop.f32.mrb[16].mxu0 }
 0x30d   : > { %v948_v41 = vadd.f32 %v947_v40, %v879_v39  ;;  %v949_v42 = vpop.f32.mrb[17].mxu0 }
 0x30e   : > { %v950_v43 = vadd.f32 %v949_v42, %v879_v39 }
 0x310   : > { %v954_v44 = vcombine.low %v948_v41, %v950_v43 }
 0x312   : > { %956 = vst [vmem:[%s242_s10] sm:$0xff] %v954_v44 }
 0x313   : > { %1212 = shalt.err (!%p1209_p5)
}
 0x314   : > { %s1213_s25 = scalar_lea.hbm %s1576_s14, 128  ;;  %s1217_s7 = scalar_lea.hbm %s1628_s5, 256 }
 0x315   : > { %p1214_p6 = scmp.ne.s32.totalorder %s1576_s14, %s1213_s25  ;;  %p1218_p10 = scmp.lt.u32.totalorder %s1576_s14, %s1628_s5 }
 0x316   : > { %p1219_p11 = scmp.lt.u32.totalorder %s1217_s7, %s1213_s25  ;;  %p1221_p13 = scmp.lt.u32.totalorder %s1213_s25, %s1576_s14 }
 0x317   : > { %p1215_p7 = pnand %p1214_p6, %p1352_p4 }
 0x318   : > { %p1220_p12 = por %p1219_p11, %p1218_p10 }
 0x319   : > { %p1216_p9 = pneg %p1215_p7 }
 0x31a   : > { %p1222_p0 = por %p1221_p13, %p1220_p12 }
 0x31c   : > { %p1223_p1 = pnand %p1222_p0, %p1216_p9 }
 0x31e   : > { %1226 = shalt.err (!%p1223_p1)
}
 0x31f   : > { %1139 = dma.vmem_to_hbm [thread:$0]  (%p1352_p4), %s1578_s11, 128, %s1576_s14, %s958_s15  }
 0x320 PF: > { %p1145_p2 = scmp.ge.s32.totalorder %s1277_s23, 2  ;;  %s986_s10 = sand.u32 1, %s1257_s18  }
 0x321   : > { %s987_s12 = scalar_lea.sflag [#allocation3], %s986_s10 }
 0x322   : > { %p1142_p3 = pnand %p1145_p2, %p1359_p8 }
 0x324   : > { %1252 = dma.done.wait (!%p1142_p3), %s987_s12, 128  }
 0x325   : > { %1254 = vsyncadd (!%p1142_p3), %s987_s12, 4294967168  ;;  %s18_s23 = sadd.s32 1, %s1277_s23   ;;  %s1631_s18 = smov %s1261_s19 }
 0x326   : > { %p15_p5 = scmp.ge.s32.totalorder %s18_s23, 4   ;;  %s1632_s19 = smov %s1265_s20 }
 0x327   : > { %s1633_s20 = smov %s1365_s6  ;;  %s1634_s21 = smov %s1273_s22 }
 0x328   : > { %s1635_s22 = smov %s1637_s26  ;;  %17 = sbr.rel (!%p15_p5) target bundleno = 4 (0x4), region = 75 }
 0x32f   :  { %992 = vsyncpa [#allocation3], 1 }
 0x330   :  { %994 = vsyncpa [#allocation3 + $0x1], 1 }

</bundles_post_ra>
